<compile_context>
chip_gen: v7x
topology: tpu7x:2x2x1
jax: 0.10.0
libtpu: 0.0.40
codegen_flags: <defaults>
</compile_context>

<pallas_src>
import functools

import jax
import jax.numpy as jnp
from jax import lax
from jax.experimental import pallas as pl
from jax.experimental.pallas import tpu as pltpu


def _round_up(x, m):
    return (x + m - 1) // m * m


def _cdiv(a, b):
    return (a + b - 1) // b


# ---------------------------------------------------------------------------
# Kernel 1: row-wise L2 normalization of the raw input, emitting padded bf16 z.
# ---------------------------------------------------------------------------
def _normalize_kernel(x_ref, z_ref, *, n_valid, d_valid, tm,
                      mask_rows, mask_cols):
    x = x_ref[...].astype(jnp.float32)                 # (tm, d_pad); pad = garbage
    if mask_rows or mask_cols:
        ok = None
        if mask_rows:
            rows = pl.program_id(0) * tm + lax.broadcasted_iota(
                jnp.int32, (tm, 1), 0)
            ok = rows < n_valid
        if mask_cols:
            cols = lax.broadcasted_iota(jnp.int32, (1, x.shape[1]), 1)
            cok = cols < d_valid
            ok = cok if ok is None else jnp.logical_and(ok, cok)
        x = jnp.where(ok, x, 0.0)
    sq = jnp.sum(x * x, axis=1, keepdims=True)
    # rsqrt on the EUP; equivalent to F.normalize's x / max(||x||, 1e-12).
    inv = lax.rsqrt(jnp.maximum(sq, jnp.float32(1e-24)))
    z_ref[...] = (x * inv).astype(z_ref.dtype)


# ---------------------------------------------------------------------------
# Kernel 2: flash-style NT-Xent over (row-block, key-block) tiles.
# ---------------------------------------------------------------------------
def _ntxent_flash_kernel(zq_ref, zk_ref, out_ref, m_sc, l_sc, pos_sc, *,
                         n_valid, batch_size, inv_temp, tm, tn,
                         mask_padded_cols, mask_padded_rows):
    r = pl.program_id(0)
    c = pl.program_id(1)
    nc = pl.num_programs(1)
    neg_big = jnp.float32(-1e30)

    @pl.when(c == 0)
    def _init():
        m_sc[...] = jnp.full((tm, 1), -jnp.inf, jnp.float32)
        l_sc[...] = jnp.zeros((tm, 1), jnp.float32)
        pos_sc[...] = jnp.zeros((tm, 1), jnp.float32)

    # (tm, tn) similarity tile on the MXU: bf16 inputs, f32 accumulation.
    s = lax.dot_general(zq_ref[...], zk_ref[...],
                        (((1,), (1,)), ((), ())),
                        preferred_element_type=jnp.float32)
    logits = s * jnp.float32(inv_temp)

    # ---- scalar block classification (scalar unit only) --------------------
    lo_r = r * tm
    lo_c = c * tn
    diag_hit = jnp.logical_and(lo_r < lo_c + tn, lo_c < lo_r + tm)
    is_last_c = c == nc - 1
    needs_mask = diag_hit
    if mask_padded_cols:                         # static
        needs_mask = jnp.logical_or(needs_mask, is_last_c)

    def _update(tile):
        # Online logsumexp: one full-tile exp + narrow (tm,1) carries.
        m_prev = m_sc[...]
        m_new = jnp.maximum(m_prev, jnp.max(tile, axis=1, keepdims=True))
        p = jnp.exp(tile - m_new)                # exp(-1e30 - finite) == 0 exactly
        l_sc[...] = (jnp.exp(m_prev - m_new) * l_sc[...]
                     + jnp.sum(p, axis=1, keepdims=True))
        m_sc[...] = m_new

    @pl.when(needs_mask)
    def _masked_update():
        rows = lo_r + lax.broadcasted_iota(jnp.int32, (tm, 1), 0)
        cols = lo_c + lax.broadcasted_iota(jnp.int32, (1, tn), 1)
        invalid = rows == cols                   # broadcast (tm,1) vs (1,tn)
        if mask_padded_cols:                     # static; only the last key block
            invalid = jnp.logical_or(invalid, cols >= n_valid)
        _update(jnp.where(invalid, neg_big, logits))

    @pl.when(jnp.logical_not(needs_mask))
    def _plain_update():
        _update(logits)

    # ---- positive term: logits[i, (i + B) mod 2B] ---------------------------
    # Scalar arc test: does this key block intersect the (possibly wrapping)
    # arc of positive columns for this row block?  At most two key blocks per
    # row block ever pass, so the (tm,tn) select + row-reduce is rare.
    hi_r = jnp.minimum(lo_r + tm, n_valid) - 1
    a = lo_r + batch_size
    a = jnp.where(a >= n_valid, a - n_valid, a)
    b = hi_r + batch_size
    b = jnp.where(b >= n_valid, b - n_valid, b)
    p_hi = jnp.minimum(lo_c + tn, n_valid) - 1
    hit_no_wrap = jnp.logical_and(lo_c <= b, p_hi >= a)
    hit_wrap = jnp.logical_or(p_hi >= a, lo_c <= b)
    block_has_pos = jnp.where(a <= b, hit_no_wrap, hit_wrap)
    block_has_rows = lo_r < n_valid

    @pl.when(jnp.logical_and(block_has_pos, block_has_rows))
    def _positive():
        rows = lo_r + lax.broadcasted_iota(jnp.int32, (tm, 1), 0)
        cols = lo_c + lax.broadcasted_iota(jnp.int32, (1, tn), 1)
        pos_col = rows + batch_size
        pos_col = jnp.where(pos_col >= n_valid, pos_col - n_valid, pos_col)
        hit = cols == pos_col
        pos_sc[...] += jnp.sum(jnp.where(hit, logits, 0.0), axis=1,
                               keepdims=True)

    # ---- finalize: per-row (lse - pos); zero invalid rows -------------------
    @pl.when(is_last_c)
    def _finalize():
        per_row = m_sc[...] + jnp.log(l_sc[...]) - pos_sc[...]
        if mask_padded_rows:                     # static
            rows = lo_r + lax.broadcasted_iota(jnp.int32, (tm, 1), 0)
            per_row = jnp.where(rows < n_valid, per_row, 0.0)
        out_ref[...] = per_row


# ---------------------------------------------------------------------------
# Wrapper
# ---------------------------------------------------------------------------
def ntxent_loss(representations, batch_size, temperature, *,
                block_rows=None, block_cols=None):
    """representations: (2*batch_size, D). Returns the scalar f32 NT-Xent loss."""
    n = 2 * batch_size
    rows, d = representations.shape
    assert rows == n, "representations must have 2*batch_size rows"

    n_pad = _round_up(max(n, 16), 16)            # bf16 sublane granule
    d_pad = _round_up(d, 128)                    # lane granule

    # ---- row tile ----------------------------------------------------------
    if block_rows is None:
        tm = min(256, n_pad)
    else:
        tm = min(_round_up(int(block_rows), 16), n_pad)

    # ---- key tile: as wide as a ~30 MiB working-set budget allows ----------
    budget = 30 * 1024 * 1024
    per_col = 4 * d_pad + 20 * tm                # dbl-buffered bf16 keys + f32 temps
    if block_cols is None:
        tn = max(16, (budget // per_col) // 16 * 16)
        tn = min(tn, 2048, n_pad)
        tn = max(tn, min(n_pad, 128))
        if n_pad * per_col <= budget:
            tn = n_pad                           # fully VMEM-resident keys
    else:
        tn = min(_round_up(int(block_cols), 16), n_pad)

    nb_r = _cdiv(n_pad, tm)
    nb_c = _cdiv(n_pad, tn)

    # ---- VMEM limits sized to need (v7x has only 64 MiB / TC) --------------
    in_itemsize = jnp.dtype(representations.dtype).itemsize
    t1 = min(256, n_pad)
    nb1 = _cdiv(n_pad, t1)
    est1 = (2 * t1 * d_pad * in_itemsize + 2 * t1 * d_pad * 2
            + 4 * t1 * d_pad * 4 + (2 << 20))
    vmem1 = int(min(48 << 20, max(16 << 20, est1)))
    est2 = (2 * tm * d_pad * 2 + 2 * tn * d_pad * 2   # dbl-buffered bf16 tiles
            + 5 * tm * tn * 4                          # f32 (tm,tn) temporaries
            + 8 * tm * 128 * 4 + (2 << 20))
    vmem2 = int(min(48 << 20, max(24 << 20, est2)))

    # ---- kernel 1: normalize raw input -> padded bf16 z (no host pad/cast) --
    z = pl.pallas_call(
        functools.partial(
            _normalize_kernel, n_valid=n, d_valid=d, tm=t1,
            mask_rows=(nb1 * t1 != n), mask_cols=(d_pad != d)),
        out_shape=jax.ShapeDtypeStruct((n_pad, d_pad), jnp.bfloat16),
        grid_spec=pltpu.PrefetchScalarGridSpec(
            num_scalar_prefetch=0,
            grid=(nb1,),
            in_specs=[pl.BlockSpec((t1, d_pad), lambda i: (i, 0))],
            out_specs=pl.BlockSpec((t1, d_pad), lambda i: (i, 0)),
        ),
        compiler_params=pltpu.CompilerParams(
            dimension_semantics=("parallel",),
            vmem_limit_bytes=vmem1,
        ),
    )(representations)

    # ---- kernel 2: tiled similarity + online logsumexp ----------------------
    kernel = functools.partial(
        _ntxent_flash_kernel,
        n_valid=n,
        batch_size=batch_size,
        inv_temp=float(1.0 / temperature),
        tm=tm, tn=tn,
        mask_padded_cols=(nb_c * tn != n),
        mask_padded_rows=(nb_r * tm != n),
    )
    per_row = pl.pallas_call(
        kernel,
        out_shape=jax.ShapeDtypeStruct((nb_r * tm, 1), jnp.float32),
        grid_spec=pltpu.PrefetchScalarGridSpec(
            num_scalar_prefetch=0,
            grid=(nb_r, nb_c),
            in_specs=[
                pl.BlockSpec((tm, d_pad), lambda rr, cc: (rr, 0)),   # queries
                pl.BlockSpec((tn, d_pad), lambda rr, cc: (cc, 0)),   # keys
            ],
            out_specs=pl.BlockSpec((tm, 1), lambda rr, cc: (rr, 0)),
            scratch_shapes=[
                pltpu.VMEM((tm, 1), jnp.float32),   # running max  m
                pltpu.VMEM((tm, 1), jnp.float32),   # running sum  l
                pltpu.VMEM((tm, 1), jnp.float32),   # positive logit
            ],
        ),
        compiler_params=pltpu.CompilerParams(
            dimension_semantics=("parallel", "arbitrary"),
            vmem_limit_bytes=vmem2,
        ),
    )(z, z)

    # Final tiny reduction in plain JAX (keeps the row axis parallel).
    return jnp.sum(per_row) / jnp.float32(n)


# ---------------------------------------------------------------------------
# Pure-JAX reference (replicates the PyTorch forward's math)
# ---------------------------------------------------------------------------
def _reference_loss(representations, batch_size, temperature,
                    matmul_dtype=jnp.float32):
    x = representations.astype(jnp.float32)
    sq = jnp.sum(x * x, axis=1, keepdims=True)
    z = x * lax.rsqrt(jnp.maximum(sq, 1e-24))
    zm = z.astype(matmul_dtype)
    sim = jnp.dot(zm, zm.T, preferred_element_type=jnp.float32).astype(jnp.float32)
    n = 2 * batch_size
    logits = sim / temperature
    idx = jnp.arange(n)
    pos = logits[idx, (idx + batch_size) % n]
    masked = jnp.where(jnp.eye(n, dtype=bool), -1e30, logits)
    lse = jax.scipy.special.logsumexp(masked, axis=1)
    # CrossEntropy(label=0, reduction='sum') over [positive, negatives], / 2B
    return jnp.sum(lse - pos) / n


if __name__ == "__main__":
    # (batch_size, feature_dim, temperature, block_rows, block_cols)
    configs = [
        (4, 32, 0.5, None, None),    # tiny: single tile, padded rows & cols
        (21, 50, 0.25, 16, 16),      # 3x3 grid, wrap-around positives, padding
        (40, 50, 0.2, 32, 48),       # tm != tn, partial row/key blocks
        (160, 96, 0.5, None, None),  # default tiling: resident keys, 2 row blocks
    ]
    key = jax.random.PRNGKey(0)
    for cfg_idx, (bs, dim, temp, br, bc) in enumerate(configs):
        key, sub = jax.random.split(key)
        reps = jax.random.normal(sub, (2 * bs, dim), dtype=jnp.float32)

        loss = ntxent_loss(reps, bs, temp, block_rows=br, block_cols=bc)
        loss = jax.block_until_ready(loss)

        ref_bf16 = _reference_loss(reps, bs, temp, matmul_dtype=jnp.bfloat16)
        ref_f32 = _reference_loss(reps, bs, temp, matmul_dtype=jnp.float32)
        assert bool(jnp.isfinite(loss)), (cfg_idx, float(loss))
        assert jnp.allclose(loss, ref_bf16, atol=1e-4, rtol=1e-4), \
            (cfg_idx, float(loss), float(ref_bf16))
        assert jnp.allclose(loss, ref_f32, atol=5e-2, rtol=5e-2), \
            (cfg_idx, float(loss), float(ref_f32))

    print("KERNEL_OK")
</pallas_src>

<mosaic_0001>
module attributes {stable_mosaic.version = 11 : i64} {
  func.func @_normalize_kernel(%arg0: i32, %arg1: memref<16x128xf32, #tpu.memory_space<vmem>>, %arg2: memref<16x128xbf16, #tpu.memory_space<vmem>>) attributes {dimension_semantics = [#tpu.dimension_semantics<parallel>], iteration_bounds = array<i64: 1>, scalar_prefetch = 0 : i64, scratch_operands = 0 : i64, tpu.core_type = #tpu.core_type<tc>, window_params = [{transform_indices = @transform_0, window_bounds = array<i64: 16, 128>}, {transform_indices = @transform_1, window_bounds = array<i64: 16, 128>}]} {
    %c0 = arith.constant 0 : index
    %c0_0 = arith.constant 0 : index
    %0 = vector.load %arg1[%c0, %c0_0] : memref<16x128xf32, #tpu.memory_space<vmem>>, vector<16x128xf32>
    %c16_i32 = arith.constant 16 : i32
    %1 = arith.muli %arg0, %c16_i32 : i32
    %2 = tpu.iota {dimensions = array<i32: 0>} : vector<16x1xi32>
    %3 = vector.broadcast %1 : i32 to vector<16x1xi32>
    %4 = arith.addi %3, %2 : vector<16x1xi32>
    %c8_i32 = arith.constant 8 : i32
    %5 = vector.broadcast %c8_i32 : i32 to vector<16x1xi32>
    %6 = arith.cmpi slt, %4, %5 : vector<16x1xi32>
    %7 = tpu.iota {dimensions = array<i32: 1>} : vector<1x128xi32>
    %c32_i32 = arith.constant 32 : i32
    %8 = vector.broadcast %c32_i32 : i32 to vector<1x128xi32>
    %9 = arith.cmpi slt, %7, %8 : vector<1x128xi32>
    %10 = vector.broadcast %6 : vector<16x1xi1> to vector<16x128xi1>
    %11 = vector.broadcast %9 : vector<1x128xi1> to vector<16x128xi1>
    %12 = arith.andi %10, %11 : vector<16x128xi1>
    %cst = arith.constant 0.000000e+00 : f32
    %13 = vector.broadcast %cst : f32 to vector<16x128xf32>
    %14 = arith.select %12, %0, %13 : vector<16x128xi1>, vector<16x128xf32>
    %15 = arith.mulf %14, %14 : vector<16x128xf32>
    %cst_1 = arith.constant dense<0.000000e+00> : vector<16xf32>
    %16 = vector.multi_reduction <add>, %15, %cst_1 [1] : vector<16x128xf32> to vector<16xf32>
    %17 = vector.shape_cast %16 : vector<16xf32> to vector<16x1xf32>
    %cst_2 = arith.constant 1.000000e-24 : f32
    %18 = vector.broadcast %cst_2 : f32 to vector<16x1xf32>
    %19 = arith.maximumf %17, %18 : vector<16x1xf32>
    %20 = math.rsqrt %19 : vector<16x1xf32>
    %21 = vector.broadcast %20 : vector<16x1xf32> to vector<16x128xf32>
    %22 = arith.mulf %14, %21 : vector<16x128xf32>
    %23 = arith.truncf %22 : vector<16x128xf32> to vector<16x128xbf16>
    %c0_3 = arith.constant 0 : index
    %c0_4 = arith.constant 0 : index
    %24 = vector.load %arg2[%c0_3, %c0_4] : memref<16x128xbf16, #tpu.memory_space<vmem>>, vector<16x128xbf16>
    tpu.vector_store %arg2[%c0_3, %c0_4], %23 {strides = array<i32>} : memref<16x128xbf16, #tpu.memory_space<vmem>>, vector<16x128xbf16>,
    return
  }
  func.func @transform_0(%arg0: i32) -> (i32, i32) {
    %c0_i32 = arith.constant 0 : i32
    %c0_i32_0 = arith.constant 0 : i32
    return %arg0, %c0_i32 : i32, i32
  }
  func.func @transform_1(%arg0: i32) -> (i32, i32) {
    %c0_i32 = arith.constant 0 : i32
    %c0_i32_0 = arith.constant 0 : i32
    return %arg0, %c0_i32 : i32, i32
  }
}

</mosaic_0001>

<bundles_post_ra>
// kernel: tpu_custom_call.1
= control target key start
LH: loop header
LB: loop body
LE: loop exit
PB: predicated region body
PF: predicated region fallthrough
CT: control target
= control target key end

     0   :  { %6 = vsyncpa [#allocation3], 0  ;;  %s195_s0 = inlined_call_operand.hbm [shape: f32[8,32], index: 0, kind: input, shape index: {}]   ;;  %s196_s1 = inlined_call_operand.hbm [shape: bf16[16,128], index: 1, kind: output, shape index: {}]  }
   0x1   :  { %7 = vsyncpa [#allocation4], 0 }
   0x2   :  { %12 = vsyncadd [#allocation3], 128  ;;  %s154_s6 = smov [#allocation2]   ;;  %s106_s10 = scalar_lea.hbm %s195_s0, 128 }
   0x3   :  { %s13_s7 = sshll.u32 %s154_s6, 4  ;;  %p107_p0 = scmp.ne.s32.totalorder %s195_s0, %s106_s10  ;;  %s14_s7 = int_to_ptr.vmem [resolvable:$true] %s13_s7 }
   0x4   :  { %p110_p1 = scmp.lt.u32.totalorder %s106_s10, %s195_s0 }
   0x6   :  { %p112_p2 = pnand %p110_p1, %p107_p0 }
   0x8   :  { %115 = shalt.err (!%p112_p2)
}
   0x9   :  { %s116_s15 = scalar_lea.vmem %s14_s7, 128  ;;  %s120_s16 = scalar_lea.vmem %s14_s7, 256 }
   0xa   :  { %p117_p3 = scmp.ne.s32.totalorder %s14_s7, %s116_s15  ;;  %p121_p4 = scmp.lt.s32.totalorder %s14_s7, %s14_s7 }
   0xb   :  { %p122_p5 = scmp.lt.s32.totalorder %s120_s16, %s116_s15 }
   0xd   :  { %p123_p6 = por %p122_p5, %p121_p4 }
   0xf   :  { %p124_p7 = pnand %p123_p6, %p117_p3 }
  0x11   :  { %127 = shalt.err (!%p124_p7)
}
  0x12   :  { %s155_s17 = smov 128   ;;  %s156_s18 = smov 8  }
  0x13   :  { %19 = dma.hbm_to_vmem [thread:$0]  %s195_s0, 128, %s14_s7, [#allocation3], %s155_s17, %s155_s17, %s156_s18  }
  0x14   :  { %150 = dma.done.wait [#allocation3], 256  }
  0x15   :  { %151 = vsyncadd [#allocation3], 4294967040  ;;  %v34_v0 = vlaneseq  ;;  %v23_v2 = vld [vmem:[#allocation2] sm:$0xff]  ;;  %v157_v5 = vmov 0.0   ;;  %s158_s21 = smov [#allocation5]  }
  0x16   :  { %s74_s0 = sshll.u32 %s158_s21, 4  ;;  %s75_s0 = int_to_ptr.vmem [resolvable:$true] %s74_s0 }
  0x17   :  { %v35_v1 = vand.u32 127, %v34_v0  ;;  %s128_s22 = scalar_lea.vmem %s75_s0, 128  ;;  %p133_p9 = scmp.lt.s32.totalorder %s75_s0, %s75_s0 }
  0x18   :  { %p129_p8 = scmp.ne.s32.totalorder %s75_s0, %s128_s22  ;;  %p134_p10 = scmp.lt.s32.totalorder %s128_s22, %s128_s22 }
  0x19   :  { %vm36_vm0 = vcmp.lt.s32.totalorder %v35_v1, 32 }
  0x1a   :  { %v45_v3 = vsel %vm36_vm0, %v23_v2, 0.0  ;;  %p135_p11 = por %p134_p10, %p133_p9 }
  0x1b   :  { %v47_v4 = vmul.f32 %v45_v3, %v45_v3 }
  0x1c   :  { %p136_p12 = pnand %p135_p11, %p129_p8 }
  0x1d   :  { %49 = vadd.xlane.f32.xlu0 %v47_v4 }
  0x21   :  { %51 = vadd.xlane.f32.xlu0 %v157_v5 }
  0xaa   :  { %v50_v6 = vpop.xlane.xlu0 %49 }
  0xab   :  { %v53_v7 = vmax.f32 %v50_v6, 1e-24 }
  0xad   :  { %102 = vrsqrt.f32 %v53_v7 }
  0xae   :  { %v52_v8 = vpop.xlane.xlu0 %51 }
  0xaf   :  { %v54_v9 = vmax.f32 %v52_v8, 1e-24 }
  0xb1   :  { %104 = vrsqrt.f32 %v54_v9 }
  0xb7   :  { %v103_v10 = vpop.eup %102 }
  0xb8   :  { %v57_v12 = vmul.f32 %v103_v10, %v45_v3 }
  0xbb   :  { %v105_v11 = vpop.eup %104 }
  0xbc   :  { %v58_v13 = vmul.f32 0.0, %v105_v11 }
  0xbe   :  { %v93_v14 = vpack.c.bf16 %v58_v13, %v57_v12 }
  0xc0   :  { %94 = vst [vmem:[#allocation5] sm:$0xff] %v93_v14  }
  0xc1   :  { %139 = shalt.err (!%p136_p12)
}
  0xc2   :  { %s140_s25 = scalar_lea.hbm %s196_s1, 128 }
  0xc3   :  { %p141_p13 = scmp.ne.s32.totalorder %s196_s1, %s140_s25  ;;  %p144_p0 = scmp.lt.u32.totalorder %s140_s25, %s196_s1 }
  0xc5   :  { %p146_p1 = pnand %p144_p0, %p141_p13 }
  0xc7   :  { %149 = shalt.err (!%p146_p1)
}
  0xc8   :  { %s159_s30 = smov 64   ;;  %s160_s2 = smov 4  }
  0xc9   :  { %80 = dma.vmem_to_hbm [thread:$0]  %s75_s0, 128, %s196_s1, [#allocation4], %s159_s30, %s159_s30, %s160_s2  }
  0xca   :  { %152 = dma.done.wait [#allocation4], 128  }
  0xcb   :  { %153 = vsyncadd [#allocation4], 4294967168 }
  0xcc   :  { %84 = vsyncpa [#allocation3], 1 }
  0xcd   :  { %85 = vsyncpa [#allocation4], 1 }

</bundles_post_ra>
